<compile_context>
chip_gen: v7x
topology: tpu7x:2x2x1
jax: 0.10.0
libtpu: 0.0.40
codegen_flags: <defaults>
</compile_context>

<pallas_src>
import functools
import math

import numpy as np
import jax
import jax.numpy as jnp
from jax import lax
from jax.experimental import pallas as pl
from jax.experimental.pallas import tpu as pltpu


def _round_up(x, m):
    return (x + m - 1) // m * m


def _global_encoder_kernel(starts_ref, ends_ref, counts_ref, x_ref, wt_ref,
                           b_ref, o_ref, acc_ref, *, n_rows):
    # starts_ref : (1, Sp)  int32   segment start row (padding segs: start=end=0)
    # ends_ref   : (1, Sp)  int32   segment end row (exclusive)
    # counts_ref : (Sp, 1)  f32     rows per segment (0 for padding segments)
    # x_ref      : (TM, D)  f32     tile of raw h_dag rows
    # wt_ref     : (D, D)   f32     W^T  (in_dim, out_dim)
    # b_ref      : (1, D)   f32     bias
    # o_ref      : (Sp, D)  f32     output (written once, at the last step)
    # acc_ref    : (Sp, D)  f32     resident segment-sum accumulator of RAW rows
    i = pl.program_id(0)

    @pl.when(i == 0)
    def _init():
        acc_ref[...] = jnp.zeros_like(acc_ref)

    tm = x_ref.shape[0]
    row = i * tm + lax.broadcasted_iota(jnp.int32, (tm, 1), 0)      # (TM, 1)

    # Ragged last tile: rows past n_rows may hold unspecified VMEM contents;
    # zero them so 0 * garbage can never reach the accumulator.
    x = jnp.where(row < n_rows, x_ref[...], 0.0)                    # (TM, D)

    # One-hot membership: row r belongs to segment s iff starts[s] <= r < ends[s].
    # Padding segments have start == end == 0, so they match no row; rows past
    # the true input end match no segment either (all ends <= n_rows).
    starts = starts_ref[...]                                        # (1, Sp)
    ends = ends_ref[...]                                            # (1, Sp)
    onehot = jnp.logical_and(row >= starts, row < ends).astype(jnp.float32)

    # Segment-sum of raw rows as one MXU contraction over the tile rows:
    # (TM, Sp)^T-contract (TM, D) -> (Sp, D)
    acc_ref[...] += lax.dot_general(
        onehot, x, (((0,), (0,)), ((), ())),
        preferred_element_type=jnp.float32)

    # Epilogue: the Linear commutes with the (linear) segment sum, so apply it
    # once to the tiny (Sp, D) accumulator.  Bias scales by the segment counts.
    @pl.when(i == pl.num_programs(0) - 1)
    def _finalize():
        y = jnp.dot(acc_ref[...], wt_ref[...],
                    preferred_element_type=jnp.float32)
        o_ref[...] = y + counts_ref[...] * b_ref[...]


def global_encoder_forward(h_dag, w, b, obs_ptr=None, *, tm=256):
    """h_dag: (N, D) f32. w: (D, D) nn.Linear weight (out, in). b: (D,).
    obs_ptr: optional 1-D int CSR pointer array of length S+1."""
    h_dag = jnp.asarray(h_dag, jnp.float32)
    n, d = h_dag.shape

    if obs_ptr is None:
        num_seg = 1
        starts = jnp.zeros((1,), jnp.int32)
        ends = jnp.full((1,), n, jnp.int32)
    else:
        ptr = jnp.asarray(obs_ptr, jnp.int32)
        num_seg = int(ptr.shape[0]) - 1
        starts = ptr[:-1]
        ends = ptr[1:]

    # Pad the segment dim to a multiple of 8 so the resident accumulator and
    # the output stores are sublane-dense.  Padding segments are empty.
    s_pad = max(8, _round_up(num_seg, 8))
    starts_p = jnp.zeros((1, s_pad), jnp.int32).at[0, :num_seg].set(starts)
    ends_p = jnp.zeros((1, s_pad), jnp.int32).at[0, :num_seg].set(ends)
    counts_p = (ends_p - starts_p).astype(jnp.float32).reshape(s_pad, 1)

    w_t = jnp.asarray(w, jnp.float32).T          # (D_in, D_out)
    b2 = jnp.asarray(b, jnp.float32).reshape(1, d)

    # Large streaming row tile; clamp (to a multiple of 8) for tiny inputs.
    tm_eff = min(tm, _round_up(n, 8))
    grid = (pl.cdiv(n, tm_eff),)

    kernel = functools.partial(_global_encoder_kernel, n_rows=n)

    out = pl.pallas_call(
        kernel,
        out_shape=jax.ShapeDtypeStruct((s_pad, d), jnp.float32),
        grid_spec=pltpu.PrefetchScalarGridSpec(
            num_scalar_prefetch=0,
            grid=grid,
            in_specs=[
                pl.BlockSpec((1, s_pad), lambda i: (0, 0)),    # segment starts
                pl.BlockSpec((1, s_pad), lambda i: (0, 0)),    # segment ends
                pl.BlockSpec((s_pad, 1), lambda i: (0, 0)),    # segment counts
                pl.BlockSpec((tm_eff, d), lambda i: (i, 0)),   # h_dag row tile
                pl.BlockSpec((d, d), lambda i: (0, 0)),        # W^T
                pl.BlockSpec((1, d), lambda i: (0, 0)),        # bias
            ],
            out_specs=pl.BlockSpec((s_pad, d), lambda i: (0, 0)),
            scratch_shapes=[pltpu.VMEM((s_pad, d), jnp.float32)],
        ),
        compiler_params=pltpu.CompilerParams(
            dimension_semantics=("arbitrary",)),
    )(starts_p, ends_p, counts_p, h_dag, w_t, b2)
    return out[:num_seg]


def _reference(h_dag, w, b, obs_ptr=None):
    h = h_dag @ w.T + b
    if obs_ptr is None:
        return h.sum(0, keepdims=True)
    ptr = np.asarray(obs_ptr)
    segs = [h[ptr[i]:ptr[i + 1]].sum(0) for i in range(len(ptr) - 1)]
    return jnp.stack(segs, axis=0)


if __name__ == "__main__":
    key = jax.random.PRNGKey(0)
    k_x, k_w, k_b, k_x2 = jax.random.split(key, 4)

    N, D = 24, 128          # N = total DAG nodes across the batch, D = embed_dim
    h_dag = jax.random.normal(k_x, (N, D), jnp.float32)

    # Deterministic nn.Linear-style init: U(-1/sqrt(D), 1/sqrt(D))
    bound = 1.0 / math.sqrt(D)
    w = jax.random.uniform(k_w, (D, D), jnp.float32, -bound, bound)
    b = jax.random.uniform(k_b, (D,), jnp.float32, -bound, bound)

    # Path 1: segment_csr with obs_ptr (3 graphs of sizes 10, 7, 7)
    obs_ptr = np.array([0, 10, 17, 24], np.int32)
    out_seg = jax.block_until_ready(global_encoder_forward(h_dag, w, b, obs_ptr))
    ref_seg = _reference(h_dag, w, b, obs_ptr)
    assert out_seg.shape == (3, D)
    assert jnp.allclose(out_seg, ref_seg, atol=1e-4, rtol=1e-4)

    # Path 2: obs_ptr is None -> global sum with keepdims
    out_glob = jax.block_until_ready(global_encoder_forward(h_dag, w, b, None))
    ref_glob = _reference(h_dag, w, b, None)
    assert out_glob.shape == (1, D)
    assert jnp.allclose(out_glob, ref_glob, atol=1e-4, rtol=1e-4)

    # Path 3: ragged last tile (N not a multiple of the row tile) + multi-step grid
    N2 = 30
    h_dag2 = jax.random.normal(k_x2, (N2, D), jnp.float32)
    obs_ptr2 = np.array([0, 5, 5, 19, 30], np.int32)   # includes an empty segment
    out_r = jax.block_until_ready(
        global_encoder_forward(h_dag2, w, b, obs_ptr2, tm=8))
    ref_r = _reference(h_dag2, w, b, obs_ptr2)
    assert out_r.shape == (4, D)
    assert jnp.allclose(out_r, ref_r, atol=1e-4, rtol=1e-4)

    print("KERNEL_OK")
</pallas_src>

<mosaic_0001>
module attributes {stable_mosaic.version = 11 : i64} {
  func.func @_global_encoder_kernel(%arg0: i32, %arg1: memref<1x8xi32, #tpu.memory_space<vmem>>, %arg2: memref<1x8xi32, #tpu.memory_space<vmem>>, %arg3: memref<8x1xf32, #tpu.memory_space<vmem>>, %arg4: memref<24x128xf32, #tpu.memory_space<vmem>>, %arg5: memref<128x128xf32, #tpu.memory_space<vmem>>, %arg6: memref<1x128xf32, #tpu.memory_space<vmem>>, %arg7: memref<8x128xf32, #tpu.memory_space<vmem>>, %arg8: memref<8x128xf32, #tpu.memory_space<vmem>>) attributes {dimension_semantics = [#tpu.dimension_semantics<arbitrary>], iteration_bounds = array<i64: 1>, scalar_prefetch = 0 : i64, scratch_operands = 1 : i64, tpu.core_type = #tpu.core_type<tc>, window_params = [{pipeline_mode = #tpu.pipeline_mode<synchronous>, transform_indices = @transform_0, window_bounds = array<i64: 1, 8>}, {pipeline_mode = #tpu.pipeline_mode<synchronous>, transform_indices = @transform_1, window_bounds = array<i64: 1, 8>}, {pipeline_mode = #tpu.pipeline_mode<synchronous>, transform_indices = @transform_2, window_bounds = array<i64: 8, 1>}, {transform_indices = @transform_3, window_bounds = array<i64: 24, 128>}, {pipeline_mode = #tpu.pipeline_mode<synchronous>, transform_indices = @transform_4, window_bounds = array<i64: 128, 128>}, {pipeline_mode = #tpu.pipeline_mode<synchronous>, transform_indices = @transform_5, window_bounds = array<i64: 1, 128>}, {pipeline_mode = #tpu.pipeline_mode<synchronous>, transform_indices = @transform_6, window_bounds = array<i64: 8, 128>}]} {
    %c0_i32 = arith.constant 0 : i32
    %0 = arith.cmpi eq, %arg0, %c0_i32 : i32
    %1 = arith.extui %0 : i1 to i32
    %c0_i32_0 = arith.constant 0 : i32
    %2 = arith.cmpi ne, %1, %c0_i32_0 : i32
    scf.if %2 {
      %cst_14 = arith.constant 0.000000e+00 : f32
      %32 = vector.broadcast %cst_14 : f32 to vector<8x128xf32>
      %c0_15 = arith.constant 0 : index
      %c0_16 = arith.constant 0 : index
      %33 = vector.load %arg8[%c0_15, %c0_16] : memref<8x128xf32, #tpu.memory_space<vmem>>, vector<8x128xf32>
      tpu.vector_store %arg8[%c0_15, %c0_16], %32 {strides = array<i32>} : memref<8x128xf32, #tpu.memory_space<vmem>>, vector<8x128xf32>,
    } else {
    }
    %c24_i32 = arith.constant 24 : i32
    %3 = arith.muli %arg0, %c24_i32 : i32
    %4 = tpu.iota {dimensions = array<i32: 0>} : vector<24x1xi32>
    %5 = vector.broadcast %3 : i32 to vector<24x1xi32>
    %6 = arith.addi %5, %4 : vector<24x1xi32>
    %c24_i32_1 = arith.constant 24 : i32
    %7 = vector.broadcast %c24_i32_1 : i32 to vector<24x1xi32>
    %8 = arith.cmpi slt, %6, %7 : vector<24x1xi32>
    %c0 = arith.constant 0 : index
    %c0_2 = arith.constant 0 : index
    %9 = vector.load %arg4[%c0, %c0_2] : memref<24x128xf32, #tpu.memory_space<vmem>>, vector<24x128xf32>
    %cst = arith.constant 0.000000e+00 : f32
    %10 = vector.shape_cast %8 : vector<24x1xi1> to vector<24x1xi1>
    %11 = vector.broadcast %10 : vector<24x1xi1> to vector<24x128xi1>
    %12 = vector.broadcast %cst : f32 to vector<24x128xf32>
    %13 = arith.select %11, %9, %12 : vector<24x128xi1>, vector<24x128xf32>
    %c0_3 = arith.constant 0 : index
    %c0_4 = arith.constant 0 : index
    %14 = vector.load %arg1[%c0_3, %c0_4] : memref<1x8xi32, #tpu.memory_space<vmem>>, vector<1x8xi32>
    %c0_5 = arith.constant 0 : index
    %c0_6 = arith.constant 0 : index
    %15 = vector.load %arg2[%c0_5, %c0_6] : memref<1x8xi32, #tpu.memory_space<vmem>>, vector<1x8xi32>
    %16 = vector.broadcast %6 : vector<24x1xi32> to vector<24x8xi32>
    %17 = vector.broadcast %14 : vector<1x8xi32> to vector<24x8xi32>
    %18 = arith.cmpi sge, %16, %17 : vector<24x8xi32>
    %19 = vector.broadcast %6 : vector<24x1xi32> to vector<24x8xi32>
    %20 = vector.broadcast %15 : vector<1x8xi32> to vector<24x8xi32>
    %21 = arith.cmpi slt, %19, %20 : vector<24x8xi32>
    %22 = arith.andi %18, %21 : vector<24x8xi1>
    %23 = arith.extui %22 : vector<24x8xi1> to vector<24x8xi32>
    %24 = arith.sitofp %23 : vector<24x8xi32> to vector<24x8xf32>
    %c0_7 = arith.constant 0 : index
    %c0_8 = arith.constant 0 : index
    %25 = vector.load %arg8[%c0_7, %c0_8] : memref<8x128xf32, #tpu.memory_space<vmem>>, vector<8x128xf32>
    %cst_9 = arith.constant dense<0.000000e+00> : vector<8x128xf32>
    %26 = tpu.matmul %24, %13, %cst_9 {dimension_numbers = #tpu.dot_dimension_numbers<[0], [0], [1], [1], [0, 1, 1, 1], [], []>} : vector<24x8xf32>, vector<24x128xf32>, vector<8x128xf32> -> vector<8x128xf32>
    %27 = arith.addf %25, %26 : vector<8x128xf32>
    %c0_10 = arith.constant 0 : index
    %c0_11 = arith.constant 0 : index
    %28 = vector.load %arg8[%c0_10, %c0_11] : memref<8x128xf32, #tpu.memory_space<vmem>>, vector<8x128xf32>
    tpu.vector_store %arg8[%c0_10, %c0_11], %27 {strides = array<i32>} : memref<8x128xf32, #tpu.memory_space<vmem>>, vector<8x128xf32>,
    %c0_i32_12 = arith.constant 0 : i32
    %29 = arith.cmpi eq, %arg0, %c0_i32_12 : i32
    %30 = arith.extui %29 : i1 to i32
    %c0_i32_13 = arith.constant 0 : i32
    %31 = arith.cmpi ne, %30, %c0_i32_13 : i32
    scf.if %31 {
      %c0_14 = arith.constant 0 : index
      %c0_15 = arith.constant 0 : index
      %32 = vector.load %arg8[%c0_14, %c0_15] : memref<8x128xf32, #tpu.memory_space<vmem>>, vector<8x128xf32>
      %c0_16 = arith.constant 0 : index
      %c0_17 = arith.constant 0 : index
      %33 = vector.load %arg5[%c0_16, %c0_17] : memref<128x128xf32, #tpu.memory_space<vmem>>, vector<128x128xf32>
      %cst_18 = arith.constant dense<0.000000e+00> : vector<8x128xf32>
      %34 = tpu.matmul %32, %33, %cst_18 {dimension_numbers = #tpu.dot_dimension_numbers<[1], [0], [0], [1], [0, 0, 1, 1], [], []>} : vector<8x128xf32>, vector<128x128xf32>, vector<8x128xf32> -> vector<8x128xf32>
      %c0_19 = arith.constant 0 : index
      %c0_20 = arith.constant 0 : index
      %35 = vector.load %arg3[%c0_19, %c0_20] : memref<8x1xf32, #tpu.memory_space<vmem>>, vector<8x1xf32>
      %c0_21 = arith.constant 0 : index
      %c0_22 = arith.constant 0 : index
      %36 = vector.load %arg6[%c0_21, %c0_22] : memref<1x128xf32, #tpu.memory_space<vmem>>, vector<1x128xf32>
      %37 = vector.broadcast %35 : vector<8x1xf32> to vector<8x128xf32>
      %38 = vector.broadcast %36 : vector<1x128xf32> to vector<8x128xf32>
      %39 = arith.mulf %37, %38 : vector<8x128xf32>
      %40 = arith.addf %34, %39 : vector<8x128xf32>
      %c0_23 = arith.constant 0 : index
      %c0_24 = arith.constant 0 : index
      %41 = vector.load %arg7[%c0_23, %c0_24] : memref<8x128xf32, #tpu.memory_space<vmem>>, vector<8x128xf32>
      tpu.vector_store %arg7[%c0_23, %c0_24], %40 {strides = array<i32>} : memref<8x128xf32, #tpu.memory_space<vmem>>, vector<8x128xf32>,
    } else {
    }
    return
  }
  func.func @transform_0(%arg0: i32) -> (i32, i32) {
    %c0_i32 = arith.constant 0 : i32
    %c0_i32_0 = arith.constant 0 : i32
    %c0_i32_1 = arith.constant 0 : i32
    return %c0_i32, %c0_i32_0 : i32, i32
  }
  func.func @transform_1(%arg0: i32) -> (i32, i32) {
    %c0_i32 = arith.constant 0 : i32
    %c0_i32_0 = arith.constant 0 : i32
    %c0_i32_1 = arith.constant 0 : i32
    return %c0_i32, %c0_i32_0 : i32, i32
  }
  func.func @transform_2(%arg0: i32) -> (i32, i32) {
    %c0_i32 = arith.constant 0 : i32
    %c0_i32_0 = arith.constant 0 : i32
    %c0_i32_1 = arith.constant 0 : i32
    return %c0_i32, %c0_i32_0 : i32, i32
  }
  func.func @transform_3(%arg0: i32) -> (i32, i32) {
    %c0_i32 = arith.constant 0 : i32
    %c0_i32_0 = arith.constant 0 : i32
    return %arg0, %c0_i32 : i32, i32
  }
  func.func @transform_4(%arg0: i32) -> (i32, i32) {
    %c0_i32 = arith.constant 0 : i32
    %c0_i32_0 = arith.constant 0 : i32
    %c0_i32_1 = arith.constant 0 : i32
    return %c0_i32, %c0_i32_0 : i32, i32
  }
  func.func @transform_5(%arg0: i32) -> (i32, i32) {
    %c0_i32 = arith.constant 0 : i32
    %c0_i32_0 = arith.constant 0 : i32
    %c0_i32_1 = arith.constant 0 : i32
    return %c0_i32, %c0_i32_0 : i32, i32
  }
  func.func @transform_6(%arg0: i32) -> (i32, i32) {
    %c0_i32 = arith.constant 0 : i32
    %c0_i32_0 = arith.constant 0 : i32
    %c0_i32_1 = arith.constant 0 : i32
    return %c0_i32, %c0_i32_0 : i32, i32
  }
}

</mosaic_0001>

<bundles_post_ra>
// kernel: tpu_custom_call.1
= control target key start
LH: loop header
LB: loop body
LE: loop exit
PB: predicated region body
PF: predicated region fallthrough
CT: control target
= control target key end

     0   :  { %11 = vsyncpa [#allocation4], 0  ;;  %s619_s0 = inlined_call_operand.vmem [shape: s32[1,8], index: 0, kind: input, shape index: {}]   ;;  %s620_s1 = inlined_call_operand.vmem [shape: s32[1,8], index: 1, kind: input, shape index: {}]   ;;  %s621_s2 = inlined_call_operand.vmem [shape: f32[8,1], index: 2, kind: input, shape index: {}]   ;;  %s622_s3 = inlined_call_operand.hbm [shape: f32[24,128], index: 3, kind: input, shape index: {}]   ;;  %s623_s4 = inlined_call_operand.hbm [shape: f32[128,128], index: 4, kind: input, shape index: {}]   ;;  %s624_s5 = inlined_call_operand.vmem [shape: f32[1,128], index: 5, kind: input, shape index: {}]   ;;  %s625_s6 = inlined_call_operand.hbm [shape: f32[8,128], index: 6, kind: output, shape index: {}]  }
   0x1   :  { %12 = vsyncpa [#allocation7], 0 }
   0x2   :  { %13 = vsyncpa [#allocation5], 0  ;;  %s518_s21 = smov [#allocation3]   ;;  %s446_s25 = scalar_lea.hbm %s622_s3, 384 }
   0x3   :  { %s25_s22 = sshll.u32 %s518_s21, 4  ;;  %p447_p0 = scmp.ne.s32.totalorder %s622_s3, %s446_s25  ;;  %s26_s22 = int_to_ptr.vmem [resolvable:$true] %s25_s22 }
   0x4   :  { %p450_p1 = scmp.lt.u32.totalorder %s446_s25, %s622_s3 }
   0x6   :  { %p452_p2 = pnand %p450_p1, %p447_p0 }
   0x8   :  { %455 = shalt.err (!%p452_p2)
}
   0x9   :  { %s456_s30 = scalar_lea.vmem %s26_s22, 384  ;;  %p461_p4 = scmp.lt.s32.totalorder %s26_s22, %s26_s22 }
   0xa   :  { %p457_p3 = scmp.ne.s32.totalorder %s26_s22, %s456_s30  ;;  %p462_p5 = scmp.lt.s32.totalorder %s456_s30, %s456_s30 }
   0xc   :  { %p463_p6 = por %p462_p5, %p461_p4 }
   0xe   :  { %p464_p7 = pnand %p463_p6, %p457_p3 }
  0x10   :  { %467 = shalt.err (!%p464_p7)
}
  0x11   :  { %s519_s7 = smov 128   ;;  %s520_s8 = smov 8  }
  0x12   :  { %31 = dma.hbm_to_vmem [thread:$0]  %s622_s3, 384, %s26_s22, [#allocation4], %s519_s7, %s519_s7, %s520_s8  }
  0x13   :  { %s521_s11 = smov [#allocation6]   ;;  %s468_s15 = scalar_lea.hbm %s623_s4, 2048 }
  0x14   :  { %s37_s12 = sshll.u32 %s521_s11, 4  ;;  %p469_p8 = scmp.ne.s32.totalorder %s623_s4, %s468_s15  ;;  %s38_s12 = int_to_ptr.vmem [resolvable:$true] %s37_s12 }
  0x15   :  { %p472_p9 = scmp.lt.u32.totalorder %s468_s15, %s623_s4 }
  0x17   :  { %p474_p10 = pnand %p472_p9, %p469_p8 }
  0x19   :  { %477 = shalt.err (!%p474_p10)
}
  0x1a   :  { %s478_s20 = scalar_lea.vmem %s38_s12, 2048  ;;  %p483_p12 = scmp.lt.s32.totalorder %s38_s12, %s38_s12 }
  0x1b   :  { %p479_p11 = scmp.ne.s32.totalorder %s38_s12, %s478_s20  ;;  %p484_p13 = scmp.lt.s32.totalorder %s478_s20, %s478_s20 }
  0x1d   :  { %p485_p0 = por %p484_p13, %p483_p12 }
  0x1f   :  { %p486_p1 = pnand %p485_p0, %p479_p11 }
  0x21   :  { %489 = shalt.err (!%p486_p1)
}
  0x22   :  { %43 = dma.hbm_to_vmem [thread:$0]  %s623_s4, 2048, %s38_s12, [#allocation7], %s519_s7, %s519_s7, %s520_s8  }
  0x23   :  { %512 = dma.done.wait [#allocation4], 384  }
  0x24   :  { %513 = vsyncadd [#allocation4], 4294966912 }
  0x25   :  { %514 = dma.done.wait [#allocation7], 2048  }
  0x26   :  { %515 = vsyncadd [#allocation7], 4294965248  ;;  %v58_v0 = vlaneseq  ;;  %v522_v1 = vmov 0.0|0.0   ;;  %vm523_vm0 = vmmov 0   ;;  %v524_v2 = vmov 0.0   ;;  %v69_v8 = vld [vmem:[#allocation3] sm:$0xff] }
  0x27   :  { %408 = vmatprep.subr.bf16.mxu0 %v522_v1  ;;  %370 = vmatprep.mubr.msk.f32.mxu0 %vm523_vm0, %v524_v2  ;;  %v336_v6 = vld [vmem:[%s619_s0] ss:$0 sm:$0xff]  ;;  %v70_v9 = vld [vmem:[#allocation3 + $0x8] sm:$0xff]  ;;  %v71_v13 = vld [vmem:[#allocation3 + $0x10] sm:$0xff]  ;;  %vm139_vm10 = vcmask 195584   ;;  %v525_v41 = vmov 0  }
  0x28   :  { %v59_v3 = vshrl.u32 %v58_v0, 7  ;;  %411 = vmatprep.subr.bf16.mxu1 %v522_v1  ;;  %405 = vmatprep.mubr.msk.f32.mxu1 %vm523_vm0, %v524_v2  ;;  %v337_v7 = vld [vmem:[%s620_s1] ss:$0 sm:$0xff]  ;;  %v409_v10 = vpack.c.bf16 %v70_v9, %v69_v8  ;;  %v219_v14 = vld [vmem:[#allocation6] sm:$0xff]  ;;  %v221_v17 = vld [vmem:[#allocation6 + $0x10] sm:$0xff]  ;;  %s526_s27 = smov [#allocation8]  }
  0x29   :  { %v220_v15 = vld [vmem:[#allocation6 + $0x8] sm:$0xff]  ;;  %v222_v18 = vld [vmem:[#allocation6 + $0x18] sm:$0xff]  ;;  %v223_v21 = vld [vmem:[#allocation6 + $0x20] sm:$0xff]  ;;  %444 = vset.pattern.permute.xlu1 %v525_v41  ;;  %s326_s28 = sshll.u32 %s526_s27, 4  ;;  %s327_s28 = int_to_ptr.vmem [resolvable:$true] %s326_s28 }
  0x2a   :  { %v60_v4 = vadd.s32 8, %v59_v3  ;;  %v61_v5 = vadd.s32 16, %v59_v3  ;;  %vm87_vm1 = vcmp.ge.s32.totalorder %v59_v3, %v336_v6  ;;  %vm94_vm2 = vcmp.lt.s32.totalorder %v59_v3, %v337_v7  ;;  %410 = vmatpush3.bf16.msra.mxu0 %v409_v10  ;;  %v224_v22 = vld [vmem:[#allocation6 + $0x28] sm:$0xff]  ;;  %v225_v24 = vld [vmem:[#allocation6 + $0x30] sm:$0xff]  ;;  %v226_v25 = vld [vmem:[#allocation6 + $0x38] sm:$0xff]  ;;  %p495_p3 = scmp.lt.s32.totalorder %s327_s28, %s327_s28 }
  0x2b   :  { %vm97_vm5 = vmand %vm87_vm1, %vm94_vm2  ;;  %368 = vmatprep.subr.mxu0 %v524_v2  ;;  %v412_v16 = vpack.c.bf16 %v220_v15, %v219_v14  ;;  %v415_v20 = vpack.c.bf16 %v222_v18, %v221_v17  ;;  %v418_v23 = vpack.c.bf16 %v224_v22, %v223_v21  ;;  %v421_v26 = vpack.c.bf16 %v226_v25, %v225_v24  ;;  %v227_v27 = vld [vmem:[#allocation6 + $0x40] sm:$0xff]  ;;  %v228_v28 = vld [vmem:[#allocation6 + $0x48] sm:$0xff] }
  0x2c   :  { %vm88_vm3 = vcmp.ge.s32.totalorder %v60_v4, %v336_v6  ;;  %vm95_vm4 = vcmp.lt.s32.totalorder %v60_v4, %v337_v7  ;;  %v338_v11 = vsel %vm97_vm5, 1.0, %v524_v2  ;;  %vm89_vm7 = vcmp.ge.s32.totalorder %v61_v5, %v336_v6  ;;  %v229_v30 = vld [vmem:[#allocation6 + $0x50] sm:$0xff]  ;;  %v230_v31 = vld [vmem:[#allocation6 + $0x58] sm:$0xff]  ;;  %v231_v33 = vld [vmem:[#allocation6 + $0x60] sm:$0xff] }
  0x2d   :  { %vm98_vm6 = vmand %vm88_vm3, %vm95_vm4  ;;  %vm96_vm8 = vcmp.lt.s32.totalorder %v61_v5, %v337_v7  ;;  %107 = vxpose.xlu0.b32.start [1/3] (short) (narrow) %v338_v11, 8  ;;  %413 = vmatpush3.bf16.msra.mxu1 %v412_v16  ;;  %v424_v29 = vpack.c.bf16 %v228_v28, %v227_v27  ;;  %v427_v32 = vpack.c.bf16 %v230_v31, %v229_v30  ;;  %v232_v34 = vld [vmem:[#allocation6 + $0x68] sm:$0xff]  ;;  %v233_v36 = vld [vmem:[#allocation6 + $0x70] sm:$0xff] }
  0x2e   :  { %v339_v12 = vsel %vm98_vm6, 1.0, %v524_v2  ;;  %vm99_vm9 = vmand %vm89_vm7, %vm96_vm8  ;;  %369 = vmatpush3.msra.mxu0 %v71_v13  ;;  %414 = vmatprep.subr.bf16.mxu1 %v522_v1  ;;  %v430_v35 = vpack.c.bf16 %v232_v34, %v231_v33  ;;  %v234_v37 = vld [vmem:[#allocation6 + $0x78] sm:$0xff]  ;;  %v235_v40 = vld [vmem:[%s621_s2] sm:$0xff]  ;;  %s490_s2 = scalar_lea.vmem %s327_s28, 128 }
  0x2f   :  { %v340_v19 = vsel %vm99_vm9, 1.0, %v524_v2  ;;  %v433_v38 = vpack.c.bf16 %v234_v37, %v233_v36  ;;  %239 = vperm.xlu1 %444, %v235_v40   ;;  %v342_v44 = vld [vmem:[%s624_s5] ss:$0 sm:$0xff]  ;;  %p491_p2 = scmp.ne.s32.totalorder %s327_s28, %s490_s2  ;;  %p496_p4 = scmp.lt.s32.totalorder %s490_s2, %s490_s2 }
  0x31   :  { %108 = vxpose.xlu0.b32.cont [2/3] (short) (narrow) %v339_v12, 8  ;;  %416 = vmatpush3.bf16.msra.mxu1 %v415_v20  ;;  %p497_p5 = por %p496_p4, %p495_p3 }
  0x32   :  { %417 = vmatprep.subr.bf16.mxu1 %v522_v1 }
  0x33   :  { %p498_p6 = pnand %p497_p5, %p491_p2 }
  0x35   :  { %109 = vxpose.xlu0.b32.end [3/3] (short) (narrow) %v340_v19, 8  ;;  %419 = vmatpush3.bf16.msra.mxu1 %v418_v23 }
  0x36   :  { %420 = vmatprep.subr.bf16.mxu1 %v522_v1 }
  0x39   :  { %422 = vmatpush3.bf16.msra.mxu1 %v421_v26 }
  0x3a   :  { %423 = vmatprep.subr.bf16.mxu1 %v522_v1 }
  0x3d   :  { %425 = vmatpush3.bf16.msra.mxu1 %v424_v29 }
  0x3e   :  { %426 = vmatprep.subr.bf16.mxu1 %v522_v1 }
  0x41   :  { %428 = vmatpush3.bf16.msra.mxu1 %v427_v32 }
  0x42   :  { %429 = vmatprep.subr.bf16.mxu1 %v522_v1 }
  0x45   :  { %431 = vmatpush3.bf16.msra.mxu1 %v430_v35 }
  0x46   :  { %432 = vmatprep.subr.bf16.mxu1 %v522_v1 }
  0x49   :  { %434 = vmatpush3.bf16.msra.mxu1 %v433_v38 }
  0x5e   :  { %445 = vset.pattern.permute.xlu0 %v525_v41 }
  0xad   :  { %v123_v39 = vpop.trf.xlu0 }
  0xae   :  { %371 = vmatmul.mubr.msk.f32.vlgmr.msra.gmra.mrb[0].mxu0 %vm139_vm10, %v123_v39  ;;  %v240_v45 = vpop.permute.xlu1 %239 }
  0xaf   :  { %v248_v46 = vmul.f32 %v342_v44, %v240_v45 }
 0x181   :  { %v209_v42 = vpop.f32.mrb[0].mxu0 }
 0x182   :  { %v372_v43 = vpop.f32.mrb[1].mxu0  ;;  %406 = vmatmul.mubr.f32.vlgmr.msra.gmra.mrb[0].mxu1 %v209_v42 }
 0x255   :  { %v315_v47 = vpop.f32.mrb[0].mxu1 }
 0x256   :  { %v316_v48 = vadd.f32 %v315_v47, %v248_v46  ;;  %v407_v49 = vpop.f32.mrb[1].mxu1 }
 0x258   :  { %319 = vst [vmem:[#allocation8] sm:$0xff] %v316_v48 }
 0x259   :  { %501 = shalt.err (!%p498_p6)
}
 0x25a   :  { %s502_s5 = scalar_lea.hbm %s625_s6, 128 }
 0x25b   :  { %p503_p7 = scmp.ne.s32.totalorder %s625_s6, %s502_s5  ;;  %p506_p8 = scmp.lt.u32.totalorder %s502_s5, %s625_s6 }
 0x25d   :  { %p508_p9 = pnand %p506_p8, %p503_p7 }
 0x25f   :  { %511 = shalt.err (!%p508_p9)
}
 0x260   :  { %329 = dma.vmem_to_hbm [thread:$0]  %s327_s28, 128, %s625_s6, [#allocation5]  }
 0x261   :  { %516 = dma.done.wait [#allocation5], 128  }
 0x262   :  { %517 = vsyncadd [#allocation5], 4294967168 }
 0x263   :  { %333 = vsyncpa [#allocation4], 1 }
 0x264   :  { %334 = vsyncpa [#allocation7], 1 }
 0x265   :  { %335 = vsyncpa [#allocation5], 1 }

</bundles_post_ra>
